<compile_context>
chip_gen: v7x
topology: tpu7x:2x2x1
jax: 0.10.0
libtpu: 0.0.40
codegen_flags: <defaults>
</compile_context>

<pallas_src>
import jax
import jax.numpy as jnp
from jax.experimental import pallas as pl
from jax.experimental.pallas import tpu as pltpu


# ----------------------------------------------------------------------------
# Kernel
# ----------------------------------------------------------------------------
def _critic_kernel(s_ref, a_ref,
                   w1s_ref, w1a_ref, b1_ref,
                   w2_ref, b2_ref,
                   w3_ref, b3_ref,
                   q_ref):
    H = w2_ref.shape[-1]                       # hidden size (256)

    # ---- layer 1 (both heads fused, concat eliminated) ----
    h = jnp.dot(s_ref[...], w1s_ref[...], preferred_element_type=jnp.float32)
    h = h + jnp.dot(a_ref[...], w1a_ref[...], preferred_element_type=jnp.float32)
    h = jnp.maximum(h + b1_ref[...], 0.0)      # (TB, 2H), f32

    # ---- layer 2 (stacked weights, one per head) ----
    h1 = h[:, :H].astype(w2_ref.dtype)
    h2 = h[:, H:].astype(w2_ref.dtype)
    g1 = jnp.dot(h1, w2_ref[0], preferred_element_type=jnp.float32)
    g2 = jnp.dot(h2, w2_ref[1], preferred_element_type=jnp.float32)
    g = jnp.concatenate([g1, g2], axis=1)      # (TB, 2H)
    g = jnp.maximum(g + b2_ref[...], 0.0)

    # ---- layer 3 (block-diagonal [2H, 2] -> both Q values in one matmul) ----
    q = jnp.dot(g.astype(w3_ref.dtype), w3_ref[...],
                preferred_element_type=jnp.float32) + b3_ref[...]
    q_ref[...] = q.astype(q_ref.dtype)         # (TB, 2): [:, 0]=Q1, [:, 1]=Q2


# ----------------------------------------------------------------------------
# Wrapper
# ----------------------------------------------------------------------------
def critic_forward(state, action, packed_params, *, block_b=256):
    """Pallas-backed forward. Returns (q1, q2), each [batch, 1] float32."""
    (w1s, w1a, b1, w2, b2, w3, b3) = packed_params
    B, Sd = state.shape
    Ad = action.shape[1]

    compute_dtype = w1s.dtype                  # f32 or bf16 (weight storage)
    state = state.astype(compute_dtype)
    action = action.astype(compute_dtype)

    # Batch tiling: keep TB a multiple of 8 (or the full batch), pad if needed.
    TB = block_b if B >= block_b else B
    Bp = pl.cdiv(B, TB) * TB
    if Bp != B:
        pad = Bp - B
        state = jnp.pad(state, ((0, pad), (0, 0)))
        action = jnp.pad(action, ((0, pad), (0, 0)))

    grid = (Bp // TB,)

    in_specs = [
        pl.BlockSpec((TB, Sd), lambda i: (i, 0)),          # state batch block
        pl.BlockSpec((TB, Ad), lambda i: (i, 0)),          # action batch block
        pl.BlockSpec(w1s.shape, lambda i: (0, 0)),         # weights stay resident
        pl.BlockSpec(w1a.shape, lambda i: (0, 0)),
        pl.BlockSpec(b1.shape, lambda i: (0, 0)),
        pl.BlockSpec(w2.shape, lambda i: (0, 0, 0)),
        pl.BlockSpec(b2.shape, lambda i: (0, 0)),
        pl.BlockSpec(w3.shape, lambda i: (0, 0)),
        pl.BlockSpec(b3.shape, lambda i: (0, 0)),
    ]
    out_specs = pl.BlockSpec((TB, 2), lambda i: (i, 0))
    out_shape = jax.ShapeDtypeStruct((Bp, 2), jnp.float32)

    q = pl.pallas_call(
        _critic_kernel,
        grid=grid,
        in_specs=in_specs,
        out_specs=out_specs,
        out_shape=out_shape,
        compiler_params=pltpu.CompilerParams(
            dimension_semantics=("parallel",),
            vmem_limit_bytes=16 << 20,
        ),
    )(state, action, w1s, w1a, b1, w2, b2, w3, b3)

    q = q[:B]
    return q[:, 0:1], q[:, 1:2]


# ----------------------------------------------------------------------------
# Parameter construction / packing
# ----------------------------------------------------------------------------
def init_critic_params(key, state_dim, action_dim, hidden=256):
    """Per-layer params in [in, out] layout (PyTorch Linear default init)."""
    in_dim = state_dim + action_dim
    dims = [(in_dim, hidden), (hidden, hidden), (hidden, 1),
            (in_dim, hidden), (hidden, hidden), (hidden, 1)]
    params = []
    for i, (din, dout) in enumerate(dims):
        kw, kb = jax.random.split(jax.random.fold_in(key, i))
        bound = 1.0 / jnp.sqrt(din)
        w = jax.random.uniform(kw, (din, dout), jnp.float32, -bound, bound)
        b = jax.random.uniform(kb, (1, dout), jnp.float32, -bound, bound)
        params.extend([w, b])
    return tuple(params)


def pack_critic_params(raw_params, state_dim, dtype=jnp.float32):
    """Pack twin-head weights for the fused kernel.

    dtype: weight/activation storage dtype (jnp.bfloat16 recommended on
    v6e/v7x; biases and accumulation stay f32).
    """
    (w1, b1, w2, b2, w3, b3, w4, b4, w5, b5, w6, b6) = raw_params
    H = w2.shape[0]

    # layer 1: split along the input (state|action) axis, concat the two heads
    w1s = jnp.concatenate([w1[:state_dim], w4[:state_dim]], axis=1)   # [Sd, 2H]
    w1a = jnp.concatenate([w1[state_dim:], w4[state_dim:]], axis=1)   # [Ad, 2H]
    b1p = jnp.concatenate([b1, b4], axis=1)                           # [1, 2H]

    # layer 2: stacked per-head weights
    w2p = jnp.stack([w2, w5], axis=0)                                 # [2, H, H]
    b2p = jnp.concatenate([b2, b5], axis=1)                           # [1, 2H]

    # layer 3: block-diagonal so one matmul yields both Q values
    w3p = jnp.zeros((2 * H, 2), jnp.float32)
    w3p = w3p.at[:H, 0:1].set(w3).at[H:, 1:2].set(w6)                 # [2H, 2]
    b3p = jnp.concatenate([b3, b6], axis=1)                           # [1, 2]

    return (w1s.astype(dtype), w1a.astype(dtype), b1p.astype(jnp.float32),
            w2p.astype(dtype), b2p.astype(jnp.float32),
            w3p.astype(dtype), b3p.astype(jnp.float32))


# ----------------------------------------------------------------------------
# Pure-JAX reference (unpacked params, mirrors the PyTorch module exactly)
# ----------------------------------------------------------------------------
def critic_forward_ref(state, action, raw_params):
    sa = jnp.concatenate([state, action], axis=1)
    (w1, b1, w2, b2, w3, b3, w4, b4, w5, b5, w6, b6) = raw_params
    h = jax.nn.relu(sa @ w1 + b1)
    h = jax.nn.relu(h @ w2 + b2)
    q1 = h @ w3 + b3
    g = jax.nn.relu(sa @ w4 + b4)
    g = jax.nn.relu(g @ w5 + b5)
    q2 = g @ w6 + b6
    return q1, q2


if __name__ == "__main__":
    key = jax.random.PRNGKey(0)
    batch, state_dim, action_dim = 8, 16, 16

    k_s, k_a, k_p = jax.random.split(key, 3)
    state = jax.random.normal(k_s, (batch, state_dim), jnp.float32)
    action = jax.random.normal(k_a, (batch, action_dim), jnp.float32)

    raw_params = init_critic_params(k_p, state_dim, action_dim)
    # f32 packing here for a tight correctness check; pass dtype=jnp.bfloat16
    # on v6e/v7x for ~2x MXU throughput and half the weight DMA bytes.
    packed = pack_critic_params(raw_params, state_dim, dtype=jnp.float32)

    q1, q2 = critic_forward(state, action, packed)
    jax.block_until_ready((q1, q2))

    q1_ref, q2_ref = critic_forward_ref(state, action, raw_params)
    assert q1.shape == (batch, 1) and q2.shape == (batch, 1)
    assert jnp.allclose(q1, q1_ref, atol=1e-4, rtol=1e-4)
    assert jnp.allclose(q2, q2_ref, atol=1e-4, rtol=1e-4)

    print("KERNEL_OK")
</pallas_src>

<mosaic_0001>
module attributes {stable_mosaic.version = 11 : i64} {
  func.func @_critic_kernel(%arg0: i32, %arg1: memref<8x16xf32, #tpu.memory_space<vmem>>, %arg2: memref<8x16xf32, #tpu.memory_space<vmem>>, %arg3: memref<16x512xf32, #tpu.memory_space<vmem>>, %arg4: memref<16x512xf32, #tpu.memory_space<vmem>>, %arg5: memref<1x512xf32, #tpu.memory_space<vmem>>, %arg6: memref<2x256x256xf32, #tpu.memory_space<vmem>>, %arg7: memref<1x512xf32, #tpu.memory_space<vmem>>, %arg8: memref<512x2xf32, #tpu.memory_space<vmem>>, %arg9: memref<1x2xf32, #tpu.memory_space<vmem>>, %arg10: memref<8x2xf32, #tpu.memory_space<vmem>>) attributes {dimension_semantics = [#tpu.dimension_semantics<parallel>], iteration_bounds = array<i64: 1>, scalar_prefetch = 0 : i64, scratch_operands = 0 : i64, tpu.core_type = #tpu.core_type<tc>, window_params = [{transform_indices = @transform_0, window_bounds = array<i64: 8, 16>}, {transform_indices = @transform_1, window_bounds = array<i64: 8, 16>}, {pipeline_mode = #tpu.pipeline_mode<synchronous>, transform_indices = @transform_2, window_bounds = array<i64: 16, 512>}, {pipeline_mode = #tpu.pipeline_mode<synchronous>, transform_indices = @transform_3, window_bounds = array<i64: 16, 512>}, {pipeline_mode = #tpu.pipeline_mode<synchronous>, transform_indices = @transform_4, window_bounds = array<i64: 1, 512>}, {pipeline_mode = #tpu.pipeline_mode<synchronous>, transform_indices = @transform_5, window_bounds = array<i64: 2, 256, 256>}, {pipeline_mode = #tpu.pipeline_mode<synchronous>, transform_indices = @transform_6, window_bounds = array<i64: 1, 512>}, {pipeline_mode = #tpu.pipeline_mode<synchronous>, transform_indices = @transform_7, window_bounds = array<i64: 512, 2>}, {pipeline_mode = #tpu.pipeline_mode<synchronous>, transform_indices = @transform_8, window_bounds = array<i64: 1, 2>}, {transform_indices = @transform_9, window_bounds = array<i64: 8, 2>}]} {
    %c0 = arith.constant 0 : index
    %c0_0 = arith.constant 0 : index
    %0 = vector.load %arg1[%c0, %c0_0] : memref<8x16xf32, #tpu.memory_space<vmem>>, vector<8x16xf32>
    %c0_1 = arith.constant 0 : index
    %c0_2 = arith.constant 0 : index
    %1 = vector.load %arg3[%c0_1, %c0_2] : memref<16x512xf32, #tpu.memory_space<vmem>>, vector<16x512xf32>
    %cst = arith.constant dense<0.000000e+00> : vector<8x512xf32>
    %2 = tpu.matmul %0, %1, %cst {dimension_numbers = #tpu.dot_dimension_numbers<[1], [0], [0], [1], [0, 0, 1, 1], [], []>} : vector<8x16xf32>, vector<16x512xf32>, vector<8x512xf32> -> vector<8x512xf32>
    %c0_3 = arith.constant 0 : index
    %c0_4 = arith.constant 0 : index
    %3 = vector.load %arg2[%c0_3, %c0_4] : memref<8x16xf32, #tpu.memory_space<vmem>>, vector<8x16xf32>
    %c0_5 = arith.constant 0 : index
    %c0_6 = arith.constant 0 : index
    %4 = vector.load %arg4[%c0_5, %c0_6] : memref<16x512xf32, #tpu.memory_space<vmem>>, vector<16x512xf32>
    %cst_7 = arith.constant dense<0.000000e+00> : vector<8x512xf32>
    %5 = tpu.matmul %3, %4, %cst_7 {dimension_numbers = #tpu.dot_dimension_numbers<[1], [0], [0], [1], [0, 0, 1, 1], [], []>} : vector<8x16xf32>, vector<16x512xf32>, vector<8x512xf32> -> vector<8x512xf32>
    %6 = arith.addf %2, %5 : vector<8x512xf32>
    %c0_8 = arith.constant 0 : index
    %c0_9 = arith.constant 0 : index
    %7 = vector.load %arg5[%c0_8, %c0_9] : memref<1x512xf32, #tpu.memory_space<vmem>>, vector<1x512xf32>
    %8 = vector.broadcast %7 : vector<1x512xf32> to vector<8x512xf32>
    %9 = arith.addf %6, %8 : vector<8x512xf32>
    %cst_10 = arith.constant 0.000000e+00 : f32
    %10 = vector.broadcast %cst_10 : f32 to vector<8x512xf32>
    %11 = arith.maximumf %9, %10 : vector<8x512xf32>
    %12 = vector.extract_strided_slice %11 {offsets = [0, 0], sizes = [8, 256], strides = [1, 1]} : vector<8x512xf32> to vector<8x256xf32>
    %13 = vector.extract_strided_slice %11 {offsets = [0, 256], sizes = [8, 256], strides = [1, 1]} : vector<8x512xf32> to vector<8x256xf32>
    %c0_11 = arith.constant 0 : index
    %c0_12 = arith.constant 0 : index
    %c0_13 = arith.constant 0 : index
    %14 = vector.load %arg6[%c0_11, %c0_12, %c0_13] : memref<2x256x256xf32, #tpu.memory_space<vmem>>, vector<1x256x256xf32>
    %15 = vector.shape_cast %14 : vector<1x256x256xf32> to vector<256x256xf32>
    %cst_14 = arith.constant dense<0.000000e+00> : vector<8x256xf32>
    %16 = tpu.matmul %12, %15, %cst_14 {dimension_numbers = #tpu.dot_dimension_numbers<[1], [0], [0], [1], [0, 0, 1, 1], [], []>} : vector<8x256xf32>, vector<256x256xf32>, vector<8x256xf32> -> vector<8x256xf32>
    %c1 = arith.constant 1 : index
    %c0_15 = arith.constant 0 : index
    %c0_16 = arith.constant 0 : index
    %17 = vector.load %arg6[%c1, %c0_15, %c0_16] : memref<2x256x256xf32, #tpu.memory_space<vmem>>, vector<1x256x256xf32>
    %18 = vector.shape_cast %17 : vector<1x256x256xf32> to vector<256x256xf32>
    %cst_17 = arith.constant dense<0.000000e+00> : vector<8x256xf32>
    %19 = tpu.matmul %13, %18, %cst_17 {dimension_numbers = #tpu.dot_dimension_numbers<[1], [0], [0], [1], [0, 0, 1, 1], [], []>} : vector<8x256xf32>, vector<256x256xf32>, vector<8x256xf32> -> vector<8x256xf32>
    %20 = tpu.concatenate %16, %19 in 1 : vector<8x256xf32>, vector<8x256xf32> -> vector<8x512xf32>
    %c0_18 = arith.constant 0 : index
    %c0_19 = arith.constant 0 : index
    %21 = vector.load %arg7[%c0_18, %c0_19] : memref<1x512xf32, #tpu.memory_space<vmem>>, vector<1x512xf32>
    %22 = vector.broadcast %21 : vector<1x512xf32> to vector<8x512xf32>
    %23 = arith.addf %20, %22 : vector<8x512xf32>
    %cst_20 = arith.constant 0.000000e+00 : f32
    %24 = vector.broadcast %cst_20 : f32 to vector<8x512xf32>
    %25 = arith.maximumf %23, %24 : vector<8x512xf32>
    %c0_21 = arith.constant 0 : index
    %c0_22 = arith.constant 0 : index
    %26 = vector.load %arg8[%c0_21, %c0_22] : memref<512x2xf32, #tpu.memory_space<vmem>>, vector<512x2xf32>
    %cst_23 = arith.constant dense<0.000000e+00> : vector<8x2xf32>
    %27 = tpu.matmul %25, %26, %cst_23 {dimension_numbers = #tpu.dot_dimension_numbers<[1], [0], [0], [1], [0, 0, 1, 1], [], []>} : vector<8x512xf32>, vector<512x2xf32>, vector<8x2xf32> -> vector<8x2xf32>
    %c0_24 = arith.constant 0 : index
    %c0_25 = arith.constant 0 : index
    %28 = vector.load %arg9[%c0_24, %c0_25] : memref<1x2xf32, #tpu.memory_space<vmem>>, vector<1x2xf32>
    %29 = vector.broadcast %28 : vector<1x2xf32> to vector<8x2xf32>
    %30 = arith.addf %27, %29 : vector<8x2xf32>
    %c0_26 = arith.constant 0 : index
    %c0_27 = arith.constant 0 : index
    %31 = vector.load %arg10[%c0_26, %c0_27] : memref<8x2xf32, #tpu.memory_space<vmem>>, vector<8x2xf32>
    tpu.vector_store %arg10[%c0_26, %c0_27], %30 {strides = array<i32>} : memref<8x2xf32, #tpu.memory_space<vmem>>, vector<8x2xf32>,
    return
  }
  func.func @transform_0(%arg0: i32) -> (i32, i32) {
    %c0_i32 = arith.constant 0 : i32
    %c0_i32_0 = arith.constant 0 : i32
    return %arg0, %c0_i32 : i32, i32
  }
  func.func @transform_1(%arg0: i32) -> (i32, i32) {
    %c0_i32 = arith.constant 0 : i32
    %c0_i32_0 = arith.constant 0 : i32
    return %arg0, %c0_i32 : i32, i32
  }
  func.func @transform_2(%arg0: i32) -> (i32, i32) {
    %c0_i32 = arith.constant 0 : i32
    %c0_i32_0 = arith.constant 0 : i32
    %c0_i32_1 = arith.constant 0 : i32
    return %c0_i32, %c0_i32_0 : i32, i32
  }
  func.func @transform_3(%arg0: i32) -> (i32, i32) {
    %c0_i32 = arith.constant 0 : i32
    %c0_i32_0 = arith.constant 0 : i32
    %c0_i32_1 = arith.constant 0 : i32
    return %c0_i32, %c0_i32_0 : i32, i32
  }
  func.func @transform_4(%arg0: i32) -> (i32, i32) {
    %c0_i32 = arith.constant 0 : i32
    %c0_i32_0 = arith.constant 0 : i32
    %c0_i32_1 = arith.constant 0 : i32
    return %c0_i32, %c0_i32_0 : i32, i32
  }
  func.func @transform_5(%arg0: i32) -> (i32, i32, i32) {
    %c0_i32 = arith.constant 0 : i32
    %c0_i32_0 = arith.constant 0 : i32
    %c0_i32_1 = arith.constant 0 : i32
    %c0_i32_2 = arith.constant 0 : i32
    return %c0_i32, %c0_i32_0, %c0_i32_1 : i32, i32, i32
  }
  func.func @transform_6(%arg0: i32) -> (i32, i32) {
    %c0_i32 = arith.constant 0 : i32
    %c0_i32_0 = arith.constant 0 : i32
    %c0_i32_1 = arith.constant 0 : i32
    return %c0_i32, %c0_i32_0 : i32, i32
  }
  func.func @transform_7(%arg0: i32) -> (i32, i32) {
    %c0_i32 = arith.constant 0 : i32
    %c0_i32_0 = arith.constant 0 : i32
    %c0_i32_1 = arith.constant 0 : i32
    return %c0_i32, %c0_i32_0 : i32, i32
  }
  func.func @transform_8(%arg0: i32) -> (i32, i32) {
    %c0_i32 = arith.constant 0 : i32
    %c0_i32_0 = arith.constant 0 : i32
    %c0_i32_1 = arith.constant 0 : i32
    return %c0_i32, %c0_i32_0 : i32, i32
  }
  func.func @transform_9(%arg0: i32) -> (i32, i32) {
    %c0_i32 = arith.constant 0 : i32
    %c0_i32_0 = arith.constant 0 : i32
    return %arg0, %c0_i32 : i32, i32
  }
}

</mosaic_0001>

<bundles_post_ra>
// kernel: tpu_custom_call.1
= control target key start
LH: loop header
LB: loop body
LE: loop exit
PB: predicated region body
PF: predicated region fallthrough
CT: control target
= control target key end

     0   :  { %14 = vsyncpa [#allocation3], 0  ;;  %s1219_s30 = smov [#allocation2]   ;;  %s1569_s0 = inlined_call_operand.vmem [shape: f32[8,16], index: 0, kind: input, shape index: {}]   ;;  %s1570_s1 = inlined_call_operand.vmem [shape: f32[8,16], index: 1, kind: input, shape index: {}]   ;;  %s1571_s2 = inlined_call_operand.vmem [shape: f32[16,512], index: 2, kind: input, shape index: {}]   ;;  %s1572_s3 = inlined_call_operand.vmem [shape: f32[16,512], index: 3, kind: input, shape index: {}]   ;;  %s1573_s4 = inlined_call_operand.vmem [shape: f32[1,512], index: 4, kind: input, shape index: {}]   ;;  %s1574_s5 = inlined_call_operand.hbm [shape: f32[2,256,256], index: 5, kind: input, shape index: {}]   ;;  %s1575_s6 = inlined_call_operand.vmem [shape: f32[1,512], index: 6, kind: input, shape index: {}]   ;;  %s1576_s7 = inlined_call_operand.vmem [shape: f32[512,2], index: 7, kind: input, shape index: {}]   ;;  %s1577_s8 = inlined_call_operand.vmem [shape: f32[1,2], index: 8, kind: input, shape index: {}]   ;;  %s1578_s9 = inlined_call_operand.vmem [shape: f32[8,2], index: 9, kind: output, shape index: {}]  }
   0x1   :  { %s30_s10 = sshll.u32 %s1219_s30, 4  ;;  %s1195_s13 = scalar_lea.hbm %s1574_s5, 16384  ;;  %s31_s10 = int_to_ptr.vmem [resolvable:$true] %s30_s10 }
   0x2   :  { %p1196_p0 = scmp.ne.s32.totalorder %s1574_s5, %s1195_s13  ;;  %p1199_p1 = scmp.lt.u32.totalorder %s1195_s13, %s1574_s5 }
   0x4   :  { %p1201_p2 = pnand %p1199_p1, %p1196_p0 }
   0x6   :  { %1204 = shalt.err (!%p1201_p2)
}
   0x7   :  { %s1205_s18 = scalar_lea.vmem %s31_s10, 16384  ;;  %p1210_p4 = scmp.lt.s32.totalorder %s31_s10, %s31_s10 }
   0x8   :  { %p1206_p3 = scmp.ne.s32.totalorder %s31_s10, %s1205_s18  ;;  %p1211_p5 = scmp.lt.s32.totalorder %s1205_s18, %s1205_s18 }
   0xa   :  { %p1212_p6 = por %p1211_p5, %p1210_p4 }
   0xc   :  { %p1213_p7 = pnand %p1212_p6, %p1206_p3 }
   0xe   :  { %1216 = shalt.err (!%p1213_p7)
}
   0xf   :  { %s1220_s19 = smov 256   ;;  %s1221_s20 = smov 16  }
  0x10   :  { %36 = dma.hbm_to_vmem [thread:$0]  %s1574_s5, 16384, %s31_s10, [#allocation3], %s1220_s19, %s1220_s19, %s1221_s20  }
  0x11   :  { %1217 = dma.done.wait [#allocation3], 16384  }
  0x12   :  { %1218 = vsyncadd [#allocation3], 4294950912  ;;  %v1222_v0 = vmov 0.0   ;;  %v57_v1 = vld [vmem:[%s1572_s3 + $0x8] sm:$0xff]  ;;  %v59_v3 = vld [vmem:[%s1572_s3 + $0x18] sm:$0xff]  ;;  %vm64_vm0 = vcmask 130048  }
  0x13   :  { %132 = vmatprep.mubr.f32.mxu0 %v1222_v0  ;;  %203 = vmatprep.mubr.f32.mxu1 %v1222_v0  ;;  %v61_v2 = vld [vmem:[%s1572_s3 + $0x28] sm:$0xff]  ;;  %v63_v5 = vld [vmem:[%s1572_s3 + $0x38] sm:$0xff]  ;;  %v56_v6 = vld [vmem:[%s1572_s3] sm:$0xff]  ;;  %vm897_vm1 = vcmask 15360  }
  0x14   :  { %v979_v4 = vpack.c.bf16 %v61_v2, %v57_v1  ;;  %v60_v7 = vld [vmem:[%s1572_s3 + $0x20] sm:$0xff]  ;;  %v983_v8 = vpack.c.bf16 %v63_v5, %v59_v3  ;;  %v58_v10 = vld [vmem:[%s1572_s3 + $0x10] sm:$0xff]  ;;  %v48_v14 = vld [vmem:[%s1571_s2 + $0x8] sm:$0xff] }
  0x15   :  { %v981_v9 = vpack.c.bf16 %v60_v7, %v56_v6  ;;  %v62_v11 = vld [vmem:[%s1572_s3 + $0x30] sm:$0xff]  ;;  %v55_v12 = vld [vmem:[%s1570_s1] sm:$0xff]  ;;  %v52_v15 = vld [vmem:[%s1571_s2 + $0x28] sm:$0xff] }
  0x16   :  { %980 = vmatprep.subr.bf16.mxu0 %v979_v4  ;;  %v985_v13 = vpack.c.bf16 %v62_v11, %v58_v10  ;;  %v47_v16 = vld [vmem:[%s1571_s2] sm:$0xff]  ;;  %984 = vmatprep.subr.bf16.mxu1 %v983_v8  ;;  %v987_v17 = vpack.c.bf16 %v52_v15, %v48_v14  ;;  %v50_v19 = vld [vmem:[%s1571_s2 + $0x18] sm:$0xff]  ;;  %v49_v23 = vld [vmem:[%s1571_s2 + $0x10] sm:$0xff] }
  0x17   :  { %982 = vmatpush1.bf16.msra.mxu0 %v981_v9  ;;  %v51_v18 = vld [vmem:[%s1571_s2 + $0x20] sm:$0xff]  ;;  %v54_v20 = vld [vmem:[%s1571_s2 + $0x38] sm:$0xff]  ;;  %v53_v24 = vld [vmem:[%s1571_s2 + $0x30] sm:$0xff] }
  0x18   :  { %986 = vmatpush1.bf16.msra.mxu1 %v985_v13  ;;  %v989_v21 = vpack.c.bf16 %v51_v18, %v47_v16  ;;  %v991_v22 = vpack.c.bf16 %v54_v20, %v50_v19  ;;  %988 = vmatprep.subr.bf16.mxu0 %v987_v17  ;;  %v993_v25 = vpack.c.bf16 %v53_v24, %v49_v23  ;;  %v386_v26 = vld [vmem:[#allocation2 + $0x8] sm:$0xff]  ;;  %v388_v27 = vld [vmem:[#allocation2 + $0x18] sm:$0xff]  ;;  %v385_v32 = vld [vmem:[#allocation2] sm:$0xff] }
  0x19   :  { %v522_v28 = vld [vmem:[#allocation2 + $0x208] sm:$0xff]  ;;  %v995_v29 = vpack.c.bf16 %v388_v27, %v386_v26  ;;  %v524_v30 = vld [vmem:[#allocation2 + $0x218] sm:$0xff]  ;;  %v387_v33 = vld [vmem:[#allocation2 + $0x10] sm:$0xff] }
  0x1a   :  { %904 = vmatmul.mubr.msk.f32.vlgmr.msra.gmra.mrb[0].mxu0 %vm64_vm0, %v55_v12  ;;  %992 = vmatprep.subr.bf16.mxu1 %v991_v22  ;;  %v1059_v31 = vpack.c.bf16 %v524_v30, %v522_v28  ;;  %v521_v34 = vld [vmem:[#allocation2 + $0x200] sm:$0xff]  ;;  %v523_v35 = vld [vmem:[#allocation2 + $0x210] sm:$0xff]  ;;  %v390_v36 = vld [vmem:[#allocation2 + $0x28] sm:$0xff]  ;;  %v997_v41 = vpack.c.bf16 %v387_v33, %v385_v32 }
  0x1b   :  { %905 = vmatmul.mubr.msk.f32.vlgmr.msra.gmra.mrb[0].mxu1 %vm64_vm0, %v55_v12  ;;  %990 = vmatpush1.bf16.msra.mxu0 %v989_v21  ;;  %v392_v37 = vld [vmem:[#allocation2 + $0x38] sm:$0xff]  ;;  %v526_v38 = vld [vmem:[#allocation2 + $0x228] sm:$0xff]  ;;  %v46_v40 = vld [vmem:[%s1569_s0] sm:$0xff]  ;;  %v1061_v42 = vpack.c.bf16 %v523_v35, %v521_v34 }
  0x1c   :  { %994 = vmatpush1.bf16.msra.mxu1 %v993_v25  ;;  %277 = vmatprep.mubr.f32.mxu0 %v1222_v0  ;;  %v528_v39 = vld [vmem:[#allocation2 + $0x238] sm:$0xff]  ;;  %v999_v43 = vpack.c.bf16 %v392_v37, %v390_v36  ;;  %v389_v44 = vld [vmem:[#allocation2 + $0x20] sm:$0xff]  ;;  %v391_v45 = vld [vmem:[#allocation2 + $0x30] sm:$0xff] }
  0x1d   :  { %348 = vmatprep.mubr.f32.mxu1 %v1222_v0  ;;  %996 = vmatprep.subr.bf16.mxu0 %v995_v29  ;;  %v525_v46 = vld [vmem:[#allocation2 + $0x220] sm:$0xff]  ;;  %v1063_v47 = vpack.c.bf16 %v528_v39, %v526_v38  ;;  %v527_v48 = vld [vmem:[#allocation2 + $0x230] sm:$0xff]  ;;  %v394_v49 = vld [vmem:[#allocation2 + $0x48] sm:$0xff]  ;;  %v1001_v53 = vpack.c.bf16 %v391_v45, %v389_v44 }
  0x1e   :  { %1060 = vmatprep.subr.bf16.mxu1 %v1059_v31  ;;  %v396_v50 = vld [vmem:[#allocation2 + $0x58] sm:$0xff]  ;;  %v530_v51 = vld [vmem:[#allocation2 + $0x248] sm:$0xff]  ;;  %v1065_v54 = vpack.c.bf16 %v527_v48, %v525_v46  ;;  %v393_v56 = vld [vmem:[#allocation2 + $0x40] sm:$0xff] }
  0x1f   :  { %v532_v52 = vld [vmem:[#allocation2 + $0x258] sm:$0xff]  ;;  %v1003_v55 = vpack.c.bf16 %v396_v50, %v394_v49  ;;  %v395_v57 = vld [vmem:[#allocation2 + $0x50] sm:$0xff]  ;;  %v529_v58 = vld [vmem:[#allocation2 + $0x240] sm:$0xff] }
  0x20   :  { %v1067_v59 = vpack.c.bf16 %v532_v52, %v530_v51  ;;  %v531_v60 = vld [vmem:[#allocation2 + $0x250] sm:$0xff]  ;;  %v398_v61 = vld [vmem:[#allocation2 + $0x68] sm:$0xff]  ;;  %v400_v62 = vld [vmem:[#allocation2 + $0x78] sm:$0xff]  ;;  %v1005_v1 = vpack.c.bf16 %v395_v57, %v393_v56 }
  0x21   :  { %v534_v63 = vld [vmem:[#allocation2 + $0x268] sm:$0xff]  ;;  %v536_v0 = vld [vmem:[#allocation2 + $0x278] sm:$0xff]  ;;  %v1069_v2 = vpack.c.bf16 %v531_v60, %v529_v58  ;;  %v1007_v3 = vpack.c.bf16 %v400_v62, %v398_v61  ;;  %v397_v4 = vld [vmem:[#allocation2 + $0x60] sm:$0xff] }
  0x22   :  { %906 = vmatmul.mubr.msk.f32.vlgmr.msra.gmra.mrb[0].mxu0 %vm64_vm0, %v46_v40  ;;  %v399_v5 = vld [vmem:[#allocation2 + $0x70] sm:$0xff]  ;;  %v533_v6 = vld [vmem:[#allocation2 + $0x260] sm:$0xff]  ;;  %v1071_v7 = vpack.c.bf16 %v536_v0, %v534_v63  ;;  %v402_v9 = vld [vmem:[#allocation2 + $0x88] sm:$0xff] }
  0x23   :  { %907 = vmatmul.mubr.msk.f32.vlgmr.msra.gmra.mrb[0].mxu1 %vm64_vm0, %v46_v40  ;;  %998 = vmatpush1.bf16.msra.mxu0 %v997_v41  ;;  %v535_v8 = vld [vmem:[#allocation2 + $0x270] sm:$0xff]  ;;  %v404_v10 = vld [vmem:[#allocation2 + $0x98] sm:$0xff]  ;;  %v538_v11 = vld [vmem:[#allocation2 + $0x288] sm:$0xff]  ;;  %v1009_v13 = vpack.c.bf16 %v399_v5, %v397_v4 }
  0x24   :  { %1062 = vmatpush1.bf16.msra.mxu1 %v1061_v42  ;;  %1000 = vmatprep.subr.bf16.mxu0 %v999_v43  ;;  %v540_v12 = vld [vmem:[#allocation2 + $0x298] sm:$0xff]  ;;  %v1073_v14 = vpack.c.bf16 %v535_v8, %v533_v6  ;;  %v1011_v15 = vpack.c.bf16 %v404_v10, %v402_v9  ;;  %v401_v16 = vld [vmem:[#allocation2 + $0x80] sm:$0xff]  ;;  %v403_v17 = vld [vmem:[#allocation2 + $0x90] sm:$0xff] }
  0x25   :  { %1064 = vmatprep.subr.bf16.mxu1 %v1063_v47  ;;  %v537_v18 = vld [vmem:[#allocation2 + $0x280] sm:$0xff]  ;;  %v1075_v19 = vpack.c.bf16 %v540_v12, %v538_v11  ;;  %v539_v20 = vld [vmem:[#allocation2 + $0x290] sm:$0xff]  ;;  %v406_v21 = vld [vmem:[#allocation2 + $0xa8] sm:$0xff]  ;;  %v1013_v25 = vpack.c.bf16 %v403_v17, %v401_v16 }
  0x26   :  { %v408_v22 = vld [vmem:[#allocation2 + $0xb8] sm:$0xff]  ;;  %v542_v23 = vld [vmem:[#allocation2 + $0x2a8] sm:$0xff]  ;;  %v1077_v26 = vpack.c.bf16 %v539_v20, %v537_v18  ;;  %v405_v28 = vld [vmem:[#allocation2 + $0xa0] sm:$0xff] }
  0x27   :  { %1002 = vmatpush1.bf16.msra.mxu0 %v1001_v53  ;;  %v544_v24 = vld [vmem:[#allocation2 + $0x2b8] sm:$0xff]  ;;  %v1015_v27 = vpack.c.bf16 %v408_v22, %v406_v21  ;;  %v407_v29 = vld [vmem:[#allocation2 + $0xb0] sm:$0xff]  ;;  %v541_v30 = vld [vmem:[#allocation2 + $0x2a0] sm:$0xff] }
  0x28   :  { %1066 = vmatpush1.bf16.msra.mxu1 %v1065_v54  ;;  %1004 = vmatprep.subr.bf16.mxu0 %v1003_v55  ;;  %v1079_v31 = vpack.c.bf16 %v544_v24, %v542_v23  ;;  %v543_v32 = vld [vmem:[#allocation2 + $0x2b0] sm:$0xff]  ;;  %v410_v33 = vld [vmem:[#allocation2 + $0xc8] sm:$0xff]  ;;  %v412_v34 = vld [vmem:[#allocation2 + $0xd8] sm:$0xff]  ;;  %v1017_v37 = vpack.c.bf16 %v407_v29, %v405_v28 }
  0x29   :  { %1068 = vmatprep.subr.bf16.mxu1 %v1067_v59  ;;  %v546_v35 = vld [vmem:[#allocation2 + $0x2c8] sm:$0xff]  ;;  %v548_v36 = vld [vmem:[#allocation2 + $0x2d8] sm:$0xff]  ;;  %v1081_v38 = vpack.c.bf16 %v543_v32, %v541_v30  ;;  %v1019_v39 = vpack.c.bf16 %v412_v34, %v410_v33  ;;  %v409_v40 = vld [vmem:[#allocation2 + $0xc0] sm:$0xff] }
  0x2a   :  { %v411_v41 = vld [vmem:[#allocation2 + $0xd0] sm:$0xff]  ;;  %v545_v42 = vld [vmem:[#allocation2 + $0x2c0] sm:$0xff]  ;;  %v1083_v43 = vpack.c.bf16 %v548_v36, %v546_v35  ;;  %v414_v45 = vld [vmem:[#allocation2 + $0xe8] sm:$0xff] }
  0x2b   :  { %1006 = vmatpush1.bf16.msra.mxu0 %v1005_v1  ;;  %v547_v44 = vld [vmem:[#allocation2 + $0x2d0] sm:$0xff]  ;;  %v416_v46 = vld [vmem:[#allocation2 + $0xf8] sm:$0xff]  ;;  %v550_v47 = vld [vmem:[#allocation2 + $0x2e8] sm:$0xff]  ;;  %v1021_v49 = vpack.c.bf16 %v411_v41, %v409_v40 }
  0x2c   :  { %1070 = vmatpush1.bf16.msra.mxu1 %v1069_v2  ;;  %1008 = vmatprep.subr.bf16.mxu0 %v1007_v3  ;;  %v552_v48 = vld [vmem:[#allocation2 + $0x2f8] sm:$0xff]  ;;  %v1085_v50 = vpack.c.bf16 %v547_v44, %v545_v42  ;;  %v1023_v51 = vpack.c.bf16 %v416_v46, %v414_v45  ;;  %v413_v52 = vld [vmem:[#allocation2 + $0xe0] sm:$0xff]  ;;  %v415_v53 = vld [vmem:[#allocation2 + $0xf0] sm:$0xff] }
  0x2d   :  { %1072 = vmatprep.subr.bf16.mxu1 %v1071_v7  ;;  %v549_v54 = vld [vmem:[#allocation2 + $0x2e0] sm:$0xff]  ;;  %v1087_v55 = vpack.c.bf16 %v552_v48, %v550_v47  ;;  %v551_v56 = vld [vmem:[#allocation2 + $0x2f0] sm:$0xff]  ;;  %v418_v57 = vld [vmem:[#allocation2 + $0x108] sm:$0xff]  ;;  %v1025_v61 = vpack.c.bf16 %v415_v53, %v413_v52 }
  0x2e   :  { %v420_v58 = vld [vmem:[#allocation2 + $0x118] sm:$0xff]  ;;  %v554_v59 = vld [vmem:[#allocation2 + $0x308] sm:$0xff]  ;;  %v1089_v62 = vpack.c.bf16 %v551_v56, %v549_v54  ;;  %v417_v0 = vld [vmem:[#allocation2 + $0x100] sm:$0xff] }
  0x2f   :  { %1010 = vmatpush1.bf16.msra.mxu0 %v1009_v13  ;;  %v556_v60 = vld [vmem:[#allocation2 + $0x318] sm:$0xff]  ;;  %v1027_v63 = vpack.c.bf16 %v420_v58, %v418_v57  ;;  %v419_v1 = vld [vmem:[#allocation2 + $0x110] sm:$0xff]  ;;  %v553_v2 = vld [vmem:[#allocation2 + $0x300] sm:$0xff] }
  0x30   :  { %1074 = vmatpush1.bf16.msra.mxu1 %v1073_v14  ;;  %1012 = vmatprep.subr.bf16.mxu0 %v1011_v15  ;;  %v1091_v3 = vpack.c.bf16 %v556_v60, %v554_v59  ;;  %v555_v4 = vld [vmem:[#allocation2 + $0x310] sm:$0xff]  ;;  %v422_v5 = vld [vmem:[#allocation2 + $0x128] sm:$0xff]  ;;  %v424_v6 = vld [vmem:[#allocation2 + $0x138] sm:$0xff]  ;;  %v1029_v9 = vpack.c.bf16 %v419_v1, %v417_v0 }
  0x31   :  { %1076 = vmatprep.subr.bf16.mxu1 %v1075_v19  ;;  %v558_v7 = vld [vmem:[#allocation2 + $0x328] sm:$0xff]  ;;  %v560_v8 = vld [vmem:[#allocation2 + $0x338] sm:$0xff]  ;;  %v1093_v10 = vpack.c.bf16 %v555_v4, %v553_v2  ;;  %v1031_v11 = vpack.c.bf16 %v424_v6, %v422_v5  ;;  %v421_v12 = vld [vmem:[#allocation2 + $0x120] sm:$0xff] }
  0x32   :  { %v423_v13 = vld [vmem:[#allocation2 + $0x130] sm:$0xff]  ;;  %v557_v14 = vld [vmem:[#allocation2 + $0x320] sm:$0xff]  ;;  %v1095_v15 = vpack.c.bf16 %v560_v8, %v558_v7  ;;  %v426_v17 = vld [vmem:[#allocation2 + $0x148] sm:$0xff] }
  0x33   :  { %1014 = vmatpush1.bf16.msra.mxu0 %v1013_v25  ;;  %v559_v16 = vld [vmem:[#allocation2 + $0x330] sm:$0xff]  ;;  %v428_v18 = vld [vmem:[#allocation2 + $0x158] sm:$0xff]  ;;  %v562_v19 = vld [vmem:[#allocation2 + $0x348] sm:$0xff]  ;;  %v1033_v21 = vpack.c.bf16 %v423_v13, %v421_v12 }
  0x34   :  { %1078 = vmatpush1.bf16.msra.mxu1 %v1077_v26  ;;  %1016 = vmatprep.subr.bf16.mxu0 %v1015_v27  ;;  %v564_v20 = vld [vmem:[#allocation2 + $0x358] sm:$0xff]  ;;  %v1097_v22 = vpack.c.bf16 %v559_v16, %v557_v14  ;;  %v1035_v23 = vpack.c.bf16 %v428_v18, %v426_v17  ;;  %v425_v24 = vld [vmem:[#allocation2 + $0x140] sm:$0xff]  ;;  %v427_v25 = vld [vmem:[#allocation2 + $0x150] sm:$0xff] }
  0x35   :  { %1080 = vmatprep.subr.bf16.mxu1 %v1079_v31  ;;  %v561_v26 = vld [vmem:[#allocation2 + $0x340] sm:$0xff]  ;;  %v1099_v27 = vpack.c.bf16 %v564_v20, %v562_v19  ;;  %v563_v28 = vld [vmem:[#allocation2 + $0x350] sm:$0xff]  ;;  %v430_v29 = vld [vmem:[#allocation2 + $0x168] sm:$0xff]  ;;  %v1037_v33 = vpack.c.bf16 %v427_v25, %v425_v24 }
  0x36   :  { %v432_v30 = vld [vmem:[#allocation2 + $0x178] sm:$0xff]  ;;  %v566_v31 = vld [vmem:[#allocation2 + $0x368] sm:$0xff]  ;;  %v1101_v34 = vpack.c.bf16 %v563_v28, %v561_v26  ;;  %v429_v36 = vld [vmem:[#allocation2 + $0x160] sm:$0xff] }
  0x37   :  { %1018 = vmatpush1.bf16.msra.mxu0 %v1017_v37  ;;  %v568_v32 = vld [vmem:[#allocation2 + $0x378] sm:$0xff]  ;;  %v1039_v35 = vpack.c.bf16 %v432_v30, %v430_v29  ;;  %v431_v37 = vld [vmem:[#allocation2 + $0x170] sm:$0xff]  ;;  %v434_v41 = vld [vmem:[#allocation2 + $0x188] sm:$0xff] }
  0x38   :  { %1082 = vmatpush1.bf16.msra.mxu1 %v1081_v38  ;;  %1020 = vmatprep.subr.bf16.mxu0 %v1019_v39  ;;  %v565_v38 = vld [vmem:[#allocation2 + $0x360] sm:$0xff]  ;;  %v1103_v39 = vpack.c.bf16 %v568_v32, %v566_v31  ;;  %v567_v40 = vld [vmem:[#allocation2 + $0x370] sm:$0xff]  ;;  %v436_v42 = vld [vmem:[#allocation2 + $0x198] sm:$0xff]  ;;  %v1041_v45 = vpack.c.bf16 %v431_v37, %v429_v36 }
  0x39   :  { %1084 = vmatprep.subr.bf16.mxu1 %v1083_v43  ;;  %v570_v43 = vld [vmem:[#allocation2 + $0x388] sm:$0xff]  ;;  %v572_v44 = vld [vmem:[#allocation2 + $0x398] sm:$0xff]  ;;  %v1105_v46 = vpack.c.bf16 %v567_v40, %v565_v38  ;;  %v1043_v47 = vpack.c.bf16 %v436_v42, %v434_v41  ;;  %v433_v48 = vld [vmem:[#allocation2 + $0x180] sm:$0xff] }
  0x3a   :  { %v571_v52 = vld [vmem:[#allocation2 + $0x390] sm:$0xff]  ;;  %v438_v53 = vld [vmem:[#allocation2 + $0x1a8] sm:$0xff]  ;;  %v440_v54 = vld [vmem:[#allocation2 + $0x1b8] sm:$0xff] }
  0x3b   :  { %1022 = vmatpush1.bf16.msra.mxu0 %v1021_v49  ;;  %v435_v49 = vld [vmem:[#allocation2 + $0x190] sm:$0xff]  ;;  %v576_v56 = vld [vmem:[#allocation2 + $0x3b8] sm:$0xff]  ;;  %v1047_v59 = vpack.c.bf16 %v440_v54, %v438_v53  ;;  %v437_v60 = vld [vmem:[#allocation2 + $0x1a0] sm:$0xff] }
  0x3c   :  { %1086 = vmatpush1.bf16.msra.mxu1 %v1085_v50  ;;  %1024 = vmatprep.subr.bf16.mxu0 %v1023_v51  ;;  %v569_v50 = vld [vmem:[#allocation2 + $0x380] sm:$0xff]  ;;  %v1107_v51 = vpack.c.bf16 %v572_v44, %v570_v43  ;;  %v1045_v57 = vpack.c.bf16 %v435_v49, %v433_v48  ;;  %v575_v0 = vld [vmem:[#allocation2 + $0x3b0] sm:$0xff]  ;;  %v442_v1 = vld [vmem:[#allocation2 + $0x1c8] sm:$0xff] }
  0x3d   :  { %1088 = vmatprep.subr.bf16.mxu1 %v1087_v55  ;;  %v574_v55 = vld [vmem:[#allocation2 + $0x3a8] sm:$0xff]  ;;  %v1109_v58 = vpack.c.bf16 %v571_v52, %v569_v50  ;;  %v444_v2 = vld [vmem:[#allocation2 + $0x1d8] sm:$0xff]  ;;  %v579_v13 = vld [vmem:[#allocation2 + $0x3d0] sm:$0xff] }
  0x3e   :  { %v580_v4 = vld [vmem:[#allocation2 + $0x3d8] sm:$0xff]  ;;  %v1051_v7 = vpack.c.bf16 %v444_v2, %v442_v1  ;;  %v582_v17 = vld [vmem:[#allocation2 + $0x3e8] sm:$0xff]  ;;  %v445_v20 = vld [vmem:[#allocation2 + $0x1e0] sm:$0xff] }
  0x3f   :  { %1026 = vmatpush1.bf16.msra.mxu0 %v1025_v61  ;;  %v439_v61 = vld [vmem:[#allocation2 + $0x1b0] sm:$0xff]  ;;  %v448_v16 = vld [vmem:[#allocation2 + $0x1f8] sm:$0xff]  ;;  %v581_v24 = vld [vmem:[#allocation2 + $0x3e0] sm:$0xff] }
  0x40   :  { %1090 = vmatpush1.bf16.msra.mxu1 %v1089_v62  ;;  %1028 = vmatprep.subr.bf16.mxu0 %v1027_v63  ;;  %v573_v62 = vld [vmem:[#allocation2 + $0x3a0] sm:$0xff]  ;;  %v1111_v63 = vpack.c.bf16 %v576_v56, %v574_v55  ;;  %v1049_v5 = vpack.c.bf16 %v439_v61, %v437_v60  ;;  %v584_v19 = vld [vmem:[#allocation2 + $0x3f8] sm:$0xff]  ;;  %v583_v25 = vld [vmem:[#allocation2 + $0x3f0] sm:$0xff] }
  0x41   :  { %1092 = vmatprep.subr.bf16.mxu1 %v1091_v3  ;;  %v578_v3 = vld [vmem:[#allocation2 + $0x3c8] sm:$0xff]  ;;  %v1113_v6 = vpack.c.bf16 %v575_v0, %v573_v62  ;;  %v1121_v26 = vpack.c.bf16 %v583_v25, %v581_v24  ;;  %v734_v29 = vld [vmem:[%s1576_s7 + $0x180] sm:$0xff]  ;;  %v704_v55 = vld [vmem:[%s1576_s7 + $0x90] sm:$0xff] }
  0x42   :  { %v1115_v8 = vpack.c.bf16 %v580_v4, %v578_v3  ;;  %v703_v28 = vld [vmem:[%s1576_s7 + $0x88] sm:$0xff]  ;;  %v355_v36 = vld [vmem:[%s1573_s4] sm:$0xf]  ;;  %v705_v56 = vld [vmem:[%s1576_s7 + $0x98] sm:$0xff] }
  0x43   :  { %1030 = vmatpush1.bf16.msra.mxu0 %v1029_v9  ;;  %v441_v9 = vld [vmem:[#allocation2 + $0x1c0] sm:$0xff]  ;;  %v735_v31 = vld [vmem:[%s1576_s7 + $0x188] sm:$0xff]  ;;  %v1127_v1 = vpack.c.bf16 %v705_v56, %v704_v55  ;;  %v688_v2 = vld [vmem:[%s1576_s7 + $0x10] sm:$0xff] }
  0x44   :  { %1094 = vmatpush1.bf16.msra.mxu1 %v1093_v10  ;;  %1032 = vmatprep.subr.bf16.mxu0 %v1031_v11  ;;  %v443_v10 = vld [vmem:[#allocation2 + $0x1d0] sm:$0xff]  ;;  %v577_v11 = vld [vmem:[#allocation2 + $0x3c0] sm:$0xff]  ;;  %v1155_v32 = vpack.c.bf16 %v735_v31, %v734_v29  ;;  %v687_v49 = vld [vmem:[%s1576_s7 + $0x8] sm:$0xff] }
  0x45   :  { %1096 = vmatprep.subr.bf16.mxu1 %v1095_v15  ;;  %v1053_v12 = vpack.c.bf16 %v443_v10, %v441_v9  ;;  %v1117_v14 = vpack.c.bf16 %v579_v13, %v577_v11  ;;  %v446_v15 = vld [vmem:[#allocation2 + $0x1e8] sm:$0xff]  ;;  %v686_v48 = vld [vmem:[%s1576_s7] sm:$0xff]  ;;  %v689_v3 = vld [vmem:[%s1576_s7 + $0x18] sm:$0xff] }
  0x46   :  { %v1055_v18 = vpack.c.bf16 %v448_v16, %v446_v15  ;;  %v718_v50 = vld [vmem:[%s1576_s7 + $0x100] sm:$0xff]  ;;  %v719_v54 = vld [vmem:[%s1576_s7 + $0x108] sm:$0xff]  ;;  %v1125_v61 = vpack.c.bf16 %v687_v49, %v686_v48  ;;  %v720_v4 = vld [vmem:[%s1576_s7 + $0x110] sm:$0xff] }
  0x47   :  { %1034 = vmatpush1.bf16.msra.mxu0 %v1033_v21  ;;  %v447_v21 = vld [vmem:[#allocation2 + $0x1f0] sm:$0xff]  ;;  %v1157_v0 = vpack.c.bf16 %v719_v54, %v718_v50  ;;  %v707_v9 = vld [vmem:[%s1576_s7 + $0xa8] sm:$0xff]  ;;  %v738_v10 = vld [vmem:[%s1576_s7 + $0x1a0] sm:$0xff] }
  0x48   :  { %1098 = vmatpush1.bf16.msra.mxu1 %v1097_v22  ;;  %1036 = vmatprep.subr.bf16.mxu0 %v1035_v23  ;;  %v1119_v22 = vpack.c.bf16 %v584_v19, %v582_v17  ;;  %v1057_v23 = vpack.c.bf16 %v447_v21, %v445_v20  ;;  %v739_v11 = vld [vmem:[%s1576_s7 + $0x1a8] sm:$0xff]  ;;  %v690_v15 = vld [vmem:[%s1576_s7 + $0x20] sm:$0xff]  ;;  %v708_v20 = vld [vmem:[%s1576_s7 + $0xb0] sm:$0xff] }
  0x49   :  { %1100 = vmatprep.subr.bf16.mxu1 %v1099_v27  ;;  %v702_v27 = vld [vmem:[%s1576_s7 + $0x80] sm:$0xff]  ;;  %v691_v16 = vld [vmem:[%s1576_s7 + $0x28] sm:$0xff]  ;;  %v709_v21 = vld [vmem:[%s1576_s7 + $0xb8] sm:$0xff] }
  0x4a   :  { %v1123_v30 = vpack.c.bf16 %v703_v28, %v702_v27  ;;  %v722_v17 = vld [vmem:[%s1576_s7 + $0x120] sm:$0xff]  ;;  %v723_v19 = vld [vmem:[%s1576_s7 + $0x128] sm:$0xff]  ;;  %v1133_v24 = vpack.c.bf16 %v691_v16, %v690_v15  ;;  %v692_v27 = vld [vmem:[%s1576_s7 + $0x30] sm:$0xff] }
  0x4b   :  { %1038 = vmatpush1.bf16.msra.mxu0 %v1037_v33  ;;  %v357_v33 = vlaneseq  ;;  %v1165_v25 = vpack.c.bf16 %v723_v19, %v722_v17  ;;  %v693_v28 = vld [vmem:[%s1576_s7 + $0x38] sm:$0xff]  ;;  %v724_v29 = vld [vmem:[%s1576_s7 + $0x130] sm:$0xff]  ;;  %v727_v48 = vld [vmem:[%s1576_s7 + $0x148] sm:$0xff] }
  0x4c   :  { %1102 = vmatpush1.bf16.msra.mxu1 %v1101_v34  ;;  %1040 = vmatprep.subr.bf16.mxu0 %v1039_v35  ;;  %v725_v31 = vld [vmem:[%s1576_s7 + $0x138] sm:$0xff]  ;;  %v712_v49 = vld [vmem:[%s1576_s7 + $0xd0] sm:$0xff] }
  0x4d   :  { %1104 = vmatprep.subr.bf16.mxu1 %v1103_v39  ;;  %v1355_v34 = vshrl.u32 %v357_v33, 7  ;;  %v711_v33 = vld [vmem:[%s1576_s7 + $0xc8] sm:$0xff]  ;;  %v713_v50 = vld [vmem:[%s1576_s7 + $0xd8] sm:$0xff]  ;;  %v696_v56 = vld [vmem:[%s1576_s7 + $0x50] sm:$0xff] }
  0x4e   :  { %v1143_v55 = vpack.c.bf16 %v713_v50, %v712_v49  ;;  %v749_v15 = vld [vmem:[%s1576_s7 + $0x1f8] sm:$0xff]  ;;  %v700_v16 = vld [vmem:[%s1576_s7 + $0x70] sm:$0xff] }
  0x4f   :  { %1042 = vmatpush1.bf16.msra.mxu0 %v1041_v45  ;;  %v359_v35 = vsub.s32 0, %v1355_v34  ;;  %v367_v37 = vsub.s32 2, %v1355_v34  ;;  %v363_v38 = vsub.s32 1, %v1355_v34  ;;  %v371_v39 = vsub.s32 3, %v1355_v34  ;;  %v701_v17 = vld [vmem:[%s1576_s7 + $0x78] sm:$0xff] }
  0x50   :  { %1106 = vmatpush1.bf16.msra.mxu1 %v1105_v46  ;;  %1044 = vmatprep.subr.bf16.mxu0 %v1043_v47  ;;  %v1153_v19 = vpack.c.bf16 %v701_v17, %v700_v16  ;;  %v908_v34 = vld [vmem:[%s1577_s8] ss:$0 sm:$0xff] }
  0x51   :  { %1108 = vmatprep.subr.bf16.mxu1 %v1107_v51  ;;  %v360_v40 = vrot.slane %v355_v36, %v359_v35  ;;  %v368_v41 = vrot.slane %v355_v36, %v367_v37  ;;  %v364_v42 = vrot.slane %v355_v36, %v363_v38  ;;  %v372_v43 = vrot.slane %v355_v36, %v371_v39  ;;  %v742_v36 = vld [vmem:[%s1576_s7 + $0x1c0] sm:$0xff] }
  0x53   :  { %1046 = vmatpush1.bf16.msra.mxu0 %v1045_v57 }
  0x54   :  { %1110 = vmatpush1.bf16.msra.mxu1 %v1109_v58  ;;  %1048 = vmatprep.subr.bf16.mxu0 %v1047_v59  ;;  %v736_v58 = vld [vmem:[%s1576_s7 + $0x190] sm:$0xff]  ;;  %v737_v59 = vld [vmem:[%s1576_s7 + $0x198] sm:$0xff] }
  0x55   :  { %1112 = vmatprep.subr.bf16.mxu1 %v1111_v63 }
  0x57   :  { %1050 = vmatpush1.bf16.msra.mxu0 %v1049_v5 }
  0x58   :  { %1114 = vmatpush1.bf16.msra.mxu1 %v1113_v6  ;;  %1052 = vmatprep.subr.bf16.mxu0 %v1051_v7  ;;  %v1159_v6 = vpack.c.bf16 %v737_v59, %v736_v58  ;;  %v721_v7 = vld [vmem:[%s1576_s7 + $0x118] sm:$0xff]  ;;  %v728_v58 = vld [vmem:[%s1576_s7 + $0x150] sm:$0xff] }
  0x59   :  { %1116 = vmatprep.subr.bf16.mxu1 %v1115_v8  ;;  %v706_v8 = vld [vmem:[%s1576_s7 + $0xa0] sm:$0xff]  ;;  %v1161_v13 = vpack.c.bf16 %v721_v7, %v720_v4 }
  0x5a   :  { %v730_v7 = vld [vmem:[%s1576_s7 + $0x160] sm:$0xff] }
  0x5b   :  { %1054 = vmatpush1.bf16.msra.mxu0 %v1053_v12  ;;  %v1129_v12 = vpack.c.bf16 %v689_v3, %v688_v2 }
  0x5c   :  { %1118 = vmatpush1.bf16.msra.mxu1 %v1117_v14  ;;  %1056 = vmatprep.subr.bf16.mxu0 %v1055_v18  ;;  %v1131_v14 = vpack.c.bf16 %v707_v9, %v706_v8  ;;  %v1163_v18 = vpack.c.bf16 %v739_v11, %v738_v10  ;;  %v731_v9 = vld [vmem:[%s1576_s7 + $0x168] sm:$0xff]  ;;  %v716_v11 = vld [vmem:[%s1576_s7 + $0xf0] sm:$0xff] }
  0x5d   :  { %1120 = vmatprep.subr.bf16.mxu1 %v1119_v22  ;;  %v740_v22 = vld [vmem:[%s1576_s7 + $0x1b0] sm:$0xff]  ;;  %v1181_v10 = vpack.c.bf16 %v731_v9, %v730_v7 }
  0x5f   :  { %1058 = vmatpush1.bf16.msra.mxu0 %v1057_v23  ;;  %v741_v23 = vld [vmem:[%s1576_s7 + $0x1b8] sm:$0xff] }
  0x60   :  { %1122 = vmatpush1.bf16.msra.mxu1 %v1121_v26  ;;  %1124 = vmatprep.subr.bf16.mxu0 %v1123_v30  ;;  %v1135_v26 = vpack.c.bf16 %v709_v21, %v708_v20  ;;  %v1167_v30 = vpack.c.bf16 %v741_v23, %v740_v22  ;;  %v732_v20 = vld [vmem:[%s1576_s7 + $0x170] sm:$0xff]  ;;  %v733_v21 = vld [vmem:[%s1576_s7 + $0x178] sm:$0xff]  ;;  %v656_v23 = vld [vmem:[%s1575_s6] sm:$0xf] }
  0x61   :  { %1156 = vmatprep.subr.bf16.mxu1 %v1155_v32  ;;  %v710_v32 = vld [vmem:[%s1576_s7 + $0xc0] sm:$0xff]  ;;  %v1185_v22 = vpack.c.bf16 %v733_v21, %v732_v20 }
  0xf5   :  { %v279_v44 = vpop.f32.mrb[0].mxu0 }
  0xf6   :  { %v377_v45 = vadd.f32 %v360_v40, %v279_v44  ;;  %v350_v46 = vpop.f32.mrb[0].mxu1  ;;  %v281_v47 = vpop.f32.mrb[1].mxu0  ;;  %v743_v40 = vld [vmem:[%s1576_s7 + $0x1c8] sm:$0xff]  ;;  %v694_v44 = vld [vmem:[%s1576_s7 + $0x40] sm:$0xff] }
  0xf7   :  { %v379_v51 = vadd.f32 %v368_v41, %v350_v46  ;;  %v378_v52 = vadd.f32 %v364_v42, %v281_v47  ;;  %v352_v53 = vpop.f32.mrb[1].mxu1  ;;  %v1137_v41 = vpack.c.bf16 %v693_v28, %v692_v27  ;;  %v1169_v42 = vpack.c.bf16 %v725_v31, %v724_v29  ;;  %v726_v46 = vld [vmem:[%s1576_s7 + $0x140] sm:$0xff] }
  0xf8   :  { %v380_v57 = vadd.f32 %v372_v43, %v352_v53  ;;  %v381_v62 = vmax.f32 %v377_v45, 0.0  ;;  %v1139_v43 = vpack.c.bf16 %v711_v33, %v710_v32  ;;  %v695_v45 = vld [vmem:[%s1576_s7 + $0x48] sm:$0xff]  ;;  %v1171_v47 = vpack.c.bf16 %v743_v40, %v742_v36 }
  0xf9   :  { %v382_v60 = vmax.f32 %v378_v52, 0.0  ;;  %v383_v5 = vmax.f32 %v379_v51, 0.0  ;;  %v744_v51 = vld [vmem:[%s1576_s7 + $0x1d0] sm:$0xff]  ;;  %v745_v52 = vld [vmem:[%s1576_s7 + $0x1d8] sm:$0xff]  ;;  %v1141_v53 = vpack.c.bf16 %v695_v45, %v694_v44  ;;  %v1173_v54 = vpack.c.bf16 %v727_v48, %v726_v46 }
  0xfa   :  { %v384_v63 = vmax.f32 %v380_v57, 0.0  ;;  %v697_v57 = vld [vmem:[%s1576_s7 + $0x58] sm:$0xff]  ;;  %v1175_v59 = vpack.c.bf16 %v745_v52, %v744_v51  ;;  %v673_v27 = vrot.slane %v656_v23, %v371_v39 }
  0xfb   :  { %513 = vmatprep.mubr.f32.mxu0 %v382_v60  ;;  %v729_v60 = vld [vmem:[%s1576_s7 + $0x158] sm:$0xff] }
  0xfc   :  { %649 = vmatprep.mubr.f32.mxu1 %v384_v63  ;;  %514 = vmatmul.mubr.f32.vlgmr.msra.gmra.mrb[2].mxu0 %v381_v62  ;;  %v715_v62 = vld [vmem:[%s1576_s7 + $0xe8] sm:$0xff]  ;;  %v746_v63 = vld [vmem:[%s1576_s7 + $0x1e0] sm:$0xff]  ;;  %v1177_v2 = vpack.c.bf16 %v729_v60, %v728_v58 }
  0xfd   :  { %650 = vmatmul.mubr.f32.vlgmr.msra.gmra.mrb[2].mxu1 %v383_v5  ;;  %1126 = vmatpush3.bf16.msra.mxu0 %v1125_v61  ;;  %v714_v61 = vld [vmem:[%s1576_s7 + $0xe0] sm:$0xff] }
  0xfe   :  { %1158 = vmatpush3.bf16.msra.mxu1 %v1157_v0  ;;  %1128 = vmatprep.subr.bf16.mxu0 %v1127_v1  ;;  %v747_v0 = vld [vmem:[%s1576_s7 + $0x1e8] sm:$0xff]  ;;  %v1145_v1 = vpack.c.bf16 %v697_v57, %v696_v56  ;;  %v1147_v3 = vpack.c.bf16 %v715_v62, %v714_v61  ;;  %v698_v5 = vld [vmem:[%s1576_s7 + $0x60] sm:$0xff] }
  0xff   :  { %1160 = vmatprep.subr.bf16.mxu1 %v1159_v6  ;;  %v1179_v4 = vpack.c.bf16 %v747_v0, %v746_v63  ;;  %v699_v6 = vld [vmem:[%s1576_s7 + $0x68] sm:$0xff] }
 0x100   :  { %v1149_v8 = vpack.c.bf16 %v699_v6, %v698_v5 }
 0x101   :  { %1130 = vmatpush3.bf16.msra.mxu0 %v1129_v12  ;;  %v717_v12 = vld [vmem:[%s1576_s7 + $0xf8] sm:$0xff] }
 0x102   :  { %1162 = vmatpush3.bf16.msra.mxu1 %v1161_v13  ;;  %1132 = vmatprep.subr.bf16.mxu0 %v1131_v14  ;;  %v748_v13 = vld [vmem:[%s1576_s7 + $0x1f0] sm:$0xff]  ;;  %v1151_v14 = vpack.c.bf16 %v717_v12, %v716_v11 }
 0x103   :  { %1164 = vmatprep.subr.bf16.mxu1 %v1163_v18  ;;  %v1183_v18 = vpack.c.bf16 %v749_v15, %v748_v13 }
 0x105   :  { %1134 = vmatpush3.bf16.msra.mxu0 %v1133_v24  ;;  %v661_v24 = vrot.slane %v656_v23, %v359_v35 }
 0x106   :  { %1166 = vmatpush3.bf16.msra.mxu1 %v1165_v25  ;;  %1136 = vmatprep.subr.bf16.mxu0 %v1135_v26  ;;  %v669_v25 = vrot.slane %v656_v23, %v367_v37  ;;  %v665_v26 = vrot.slane %v656_v23, %v363_v38 }
 0x107   :  { %1168 = vmatprep.subr.bf16.mxu1 %v1167_v30 }
 0x109   :  { %1138 = vmatpush3.bf16.msra.mxu0 %v1137_v41 }
 0x10a   :  { %1170 = vmatpush3.bf16.msra.mxu1 %v1169_v42  ;;  %1140 = vmatprep.subr.bf16.mxu0 %v1139_v43 }
 0x10b   :  { %1172 = vmatprep.subr.bf16.mxu1 %v1171_v47 }
 0x10d   :  { %1142 = vmatpush3.bf16.msra.mxu0 %v1141_v53 }
 0x10e   :  { %1174 = vmatpush3.bf16.msra.mxu1 %v1173_v54  ;;  %1144 = vmatprep.subr.bf16.mxu0 %v1143_v55 }
 0x10f   :  { %1176 = vmatprep.subr.bf16.mxu1 %v1175_v59 }
 0x111   :  { %1146 = vmatpush3.bf16.msra.mxu0 %v1145_v1 }
 0x112   :  { %1178 = vmatpush3.bf16.msra.mxu1 %v1177_v2  ;;  %1148 = vmatprep.subr.bf16.mxu0 %v1147_v3 }
 0x113   :  { %1180 = vmatprep.subr.bf16.mxu1 %v1179_v4 }
 0x115   :  { %1150 = vmatpush3.bf16.msra.mxu0 %v1149_v8 }
 0x116   :  { %1182 = vmatpush3.bf16.msra.mxu1 %v1181_v10  ;;  %1152 = vmatprep.subr.bf16.mxu0 %v1151_v14 }
 0x117   :  { %1184 = vmatprep.subr.bf16.mxu1 %v1183_v18 }
 0x119   :  { %1154 = vmatpush3.bf16.msra.mxu0 %v1153_v19 }
 0x11a   :  { %1186 = vmatpush3.bf16.msra.mxu1 %v1185_v22 }
 0x1cf   :  { %v515_v28 = vpop.f32.mrb[2].mxu0 }
 0x1d0   :  { %v678_v29 = vadd.f32 %v661_v24, %v515_v28  ;;  %v651_v30 = vpop.f32.mrb[2].mxu1  ;;  %v517_v31 = vpop.f32.mrb[3].mxu0 }
 0x1d1   :  { %v680_v32 = vadd.f32 %v669_v25, %v651_v30  ;;  %v679_v33 = vadd.f32 %v665_v26, %v517_v31  ;;  %v653_v36 = vpop.f32.mrb[3].mxu1 }
 0x1d2   :  { %v681_v40 = vadd.f32 %v673_v27, %v653_v36  ;;  %v682_v42 = vmax.f32 %v678_v29, 0.0 }
 0x1d3   :  { %v683_v41 = vmax.f32 %v679_v33, 0.0  ;;  %v684_v43 = vmax.f32 %v680_v32, 0.0 }
 0x1d4   :  { %v685_v35 = vmax.f32 %v681_v40, 0.0 }
 0x1d5   :  { %821 = vmatprep.mubr.f32.mxu0 %v683_v41 }
 0x1d6   :  { %891 = vmatprep.mubr.f32.mxu1 %v685_v35  ;;  %822 = vmatmul.mubr.f32.vlgmr.msra.gmra.mrb[4].mxu0 %v682_v42 }
 0x1d7   :  { %892 = vmatmul.mubr.f32.vlgmr.msra.gmra.mrb[4].mxu1 %v684_v43 }
 0x2a9   :  { %v941_v37 = vpop.f32.mrb[4].mxu0 }
 0x2aa   :  { %v976_v38 = vpop.f32.mrb[4].mxu1  ;;  %v942_v39 = vpop.f32.mrb[5].mxu0 }
 0x2ab   :  { %v943_v44 = vadd.f32 %v942_v39, %v941_v37  ;;  %v977_v45 = vpop.f32.mrb[5].mxu1 }
 0x2ac   :  { %v978_v46 = vadd.f32 %v977_v45, %v976_v38 }
 0x2ad   :  { %v824_v47 = vadd.f32 %v943_v44, %v908_v34 }
 0x2af   :  { %v894_v48 = vadd.f32 %v978_v46, %v824_v47 }
 0x2b1   :  { %898 = vst.msk [vmem:[%s1578_s9] sm:$0xff] %vm897_vm1, %v894_v48 }
 0x2b2   :  { %903 = vsyncpa [#allocation3], 1 }

</bundles_post_ra>
